<compile_context>
chip_gen: v7x
topology: tpu7x:2x2x1
jax: 0.10.0
libtpu: 0.0.40
codegen_flags: <defaults>
</compile_context>

<pallas_src>
import jax
import jax.numpy as jnp
from jax import lax
from jax.experimental import pallas as pl
from jax.experimental.pallas import tpu as pltpu

N_BINS = 15


def _round_up(x: int, m: int) -> int:
    return ((x + m - 1) // m) * m


def _cdiv(a: int, b: int) -> int:
    return -(-a // b)


def _make_ece_kernel(n_valid: int, n_bins: int, bin_rows: int, masked: bool):
    def kernel(logits_ref, labels_ref, cnt_ref, csum_ref, asum_ref):
        i = pl.program_id(1)

        @pl.when(i == 0)
        def _():
            cnt_ref[...] = jnp.zeros_like(cnt_ref)
            csum_ref[...] = jnp.zeros_like(csum_ref)
            asum_ref[...] = jnp.zeros_like(asum_ref)

        logits = logits_ref[...].astype(jnp.float32)          # (C, TN)
        labels = labels_ref[...]                              # (1, TN) int32
        c, tn = logits.shape

        # confidence = max softmax prob = 1 / sum_c exp(logit - max)
        m = jnp.max(logits, axis=0, keepdims=True)            # (1, TN)
        denom = jnp.sum(jnp.exp(logits - m), axis=0, keepdims=True)
        conf = pl.reciprocal(denom)                           # exact (bin edges)

        # prediction = argmax over classes, first occurrence (torch.max tie-break)
        cls_idx = lax.broadcasted_iota(jnp.int32, (c, tn), 0)
        pred = jnp.min(jnp.where(logits == m, cls_idx, c), axis=0, keepdims=True)
        correct = (pred == labels).astype(jnp.float32)        # (1, TN)

        # single bin-index compare per bin row: conf in (b/nb, (b+1)/nb] -> b
        bin_idx = jnp.ceil(conf * float(n_bins)).astype(jnp.int32) - 1
        bin_idx = jnp.clip(bin_idx, 0, n_bins - 1)            # (1, TN)

        if masked:
            # sanitize out-of-bounds columns once on the (1, TN) row: they
            # match no bin row and keep NaN out of the 0*x products (the
            # wrapper no longer pads, so tail columns may hold garbage).
            col = (pl.program_id(0) * pl.num_programs(1) + i) * tn \
                + lax.broadcasted_iota(jnp.int32, (1, tn), 1)
            valid = col < n_valid
            bin_idx = jnp.where(valid, bin_idx, -1)
            conf = jnp.where(valid, conf, 0.0)

        rows = lax.broadcasted_iota(jnp.int32, (bin_rows, 1), 0)
        in_bin = rows == bin_idx                               # (bin_rows, TN)

        one = jnp.ones((), jnp.float32)
        zero = jnp.zeros((), jnp.float32)
        # per-tile lane reductions (XLU slot, otherwise idle) -> narrow partials
        cnt_p = jnp.sum(jnp.where(in_bin, one, zero), axis=1, keepdims=True)
        csum_p = jnp.sum(jnp.where(in_bin, conf, zero), axis=1, keepdims=True)
        asum_p = jnp.sum(jnp.where(in_bin, correct, zero), axis=1, keepdims=True)

        # narrow, lane-dense (bin_rows, 128) accumulators (broadcast add)
        cnt_ref[...] += cnt_p
        csum_ref[...] += csum_p
        asum_ref[...] += asum_p

    return kernel


def ece_loss(logits, labels, n_bins: int = N_BINS, max_tile_n: int = 16384):
    """Pallas ECE. logits: [N, C] (any float dtype), labels: [N] int. Returns (1,) f32."""
    n, c = logits.shape
    bin_rows = max(8, _round_up(n_bins, 8))   # 15 bins -> 16 sublane rows

    # Generation-aware VMEM budget (v5e/v6e: 128 MiB, v7x: 64 MiB per TC).
    try:
        vmem_cap = int(pltpu.get_tpu_info().vmem_capacity_bytes)
    except Exception:
        vmem_cap = 64 * 1024 * 1024            # safe lower bound (v7x per-TC)
    vmem_limit = int(min((vmem_cap * 3) // 4, 96 * 1024 * 1024))
    block_budget = vmem_limit // 3

    # Per-column VMEM: double-buffered logits (native dtype) + f32 working copy
    # of the (C, TN) exp/compare chain + labels + a few (bin_rows, TN) temps.
    in_bytes = jnp.dtype(logits.dtype).itemsize
    bytes_per_col = (2 * in_bytes * max(c, 8) + 4 * max(c, 8)
                     + 2 * 4 + 4 * 4 * bin_rows + 64)
    cap = max(128, (block_budget // bytes_per_col) // 128 * 128)
    tile = min(_round_up(max_tile_n, 128), cap, _round_up(n, 128))

    nblocks = _cdiv(n, tile)                   # column blocks actually needed
    cores = 2 if nblocks >= 2 else 1           # v7x: 2 TCs; harmless on 1-TC chips
    tpc = _cdiv(nblocks, cores)                # column blocks per core
    masked = cores * tpc * tile != n           # any partial / phantom columns?

    # Lane-dense layout: batch on the 128-lane axis, classes on sublanes.
    # No wrapper-side jnp.pad (invalid columns are masked in-kernel).
    logits_t = jnp.transpose(logits)                     # (C, N), native dtype
    labels_row = labels.astype(jnp.int32).reshape(1, n)  # (1, N) int32

    last = nblocks - 1
    if cores * tpc > nblocks:
        # Odd block count split over the cores axis: clamp the phantom block to
        # the last real one (its nominal columns are fully masked in-kernel).
        def col_block(p, i):
            return jnp.minimum(p * tpc + i, last)
    else:
        def col_block(p, i):
            return p * tpc + i

    stat = jax.ShapeDtypeStruct((cores, bin_rows, 128), jnp.float32)
    stat_spec = pl.BlockSpec((None, bin_rows, 128), lambda p, i: (p, 0, 0))

    cnt, csum, asum = pl.pallas_call(
        _make_ece_kernel(n, n_bins, bin_rows, masked),
        out_shape=(stat, stat, stat),
        grid_spec=pltpu.PrefetchScalarGridSpec(
            num_scalar_prefetch=0,
            grid=(cores, tpc),
            in_specs=[
                pl.BlockSpec((c, tile), lambda p, i: (0, col_block(p, i))),
                pl.BlockSpec((1, tile), lambda p, i: (0, col_block(p, i))),
            ],
            out_specs=(stat_spec, stat_spec, stat_spec),
        ),
        compiler_params=pltpu.CompilerParams(
            dimension_semantics=("parallel", "arbitrary"),
            vmem_limit_bytes=vmem_limit,
        ),
    )(logits_t, labels_row)

    # Tiny final combine in plain JAX: merge per-core partials + ECE formula.
    cnt = jnp.sum(cnt[:, :n_bins, 0], axis=0)     # (n_bins,)
    csum = jnp.sum(csum[:, :n_bins, 0], axis=0)
    asum = jnp.sum(asum[:, :n_bins, 0], axis=0)
    pos = cnt > 0.0
    safe = jnp.where(pos, cnt, 1.0)
    terms = jnp.where(pos, jnp.abs(csum / safe - asum / safe) * (cnt / n), 0.0)
    return jnp.sum(terms).reshape(1)


def ece_reference(logits, labels, n_bins: int = N_BINS):
    """Pure-JAX reference mirroring the PyTorch module."""
    sm = jax.nn.softmax(logits.astype(jnp.float32), axis=1)
    conf = jnp.max(sm, axis=1)
    pred = jnp.argmax(sm, axis=1)
    acc = (pred == labels).astype(jnp.float32)
    ece = jnp.zeros((1,), jnp.float32)
    for b in range(n_bins):
        lo = b / n_bins
        hi = (b + 1) / n_bins
        in_bin = (conf > lo) & (conf <= hi)
        cnt = jnp.sum(in_bin.astype(jnp.float32))
        prop = cnt / conf.shape[0]
        safe = jnp.maximum(cnt, 1.0)
        avg_acc = jnp.sum(jnp.where(in_bin, acc, 0.0)) / safe
        avg_conf = jnp.sum(jnp.where(in_bin, conf, 0.0)) / safe
        ece = ece + jnp.where(cnt > 0,
                              jnp.abs(avg_conf - avg_acc) * prop, 0.0)
    return ece


if __name__ == "__main__":
    key = jax.random.PRNGKey(0)
    k1, k2, k3, k4 = jax.random.split(key, 4)

    # Small classification problem: 256 samples, 8 classes.
    N, C = 256, 8
    logits = jax.random.normal(k1, (N, C), dtype=jnp.float32) * 2.0
    labels = jax.random.randint(k2, (N,), 0, C, dtype=jnp.int32)
    ece = ece_loss(logits, labels)
    jax.block_until_ready(ece)
    ece_ref = ece_reference(logits, labels)
    assert jnp.allclose(ece, ece_ref, atol=1e-5), (ece, ece_ref)

    # Ragged / multi-block / dual-core-grid path (exercises in-kernel masking
    # and the clamped phantom block: 700 samples, 10 classes, 256-col tiles).
    N2, C2 = 700, 10
    logits2 = jax.random.normal(k3, (N2, C2), dtype=jnp.float32) * 3.0
    labels2 = jax.random.randint(k4, (N2,), 0, C2, dtype=jnp.int32)
    ece2 = ece_loss(logits2, labels2, max_tile_n=256)
    jax.block_until_ready(ece2)
    ece2_ref = ece_reference(logits2, labels2)
    assert jnp.allclose(ece2, ece2_ref, atol=1e-5), (ece2, ece2_ref)

    print("KERNEL_OK")
</pallas_src>

<mosaic_0001>
module attributes {stable_mosaic.version = 11 : i64} {
  func.func @kernel(%arg0: i32, %arg1: i32, %arg2: memref<8x256xf32, #tpu.memory_space<vmem>>, %arg3: memref<1x256xi32, #tpu.memory_space<vmem>>, %arg4: memref<1x16x128xf32, #tpu.memory_space<vmem>>, %arg5: memref<1x16x128xf32, #tpu.memory_space<vmem>>, %arg6: memref<1x16x128xf32, #tpu.memory_space<vmem>>) attributes {dimension_semantics = [#tpu.dimension_semantics<parallel>, #tpu.dimension_semantics<arbitrary>], iteration_bounds = array<i64: 1, 1>, scalar_prefetch = 0 : i64, scratch_operands = 0 : i64, tpu.core_type = #tpu.core_type<tc>, window_params = [{transform_indices = @transform_0, window_bounds = array<i64: 8, 256>}, {transform_indices = @transform_1, window_bounds = array<i64: 1, 256>}, {transform_indices = @transform_2, window_bounds = array<i64: 1, 16, 128>}, {transform_indices = @transform_3, window_bounds = array<i64: 1, 16, 128>}, {transform_indices = @transform_4, window_bounds = array<i64: 1, 16, 128>}]} {
    %c0_i32 = arith.constant 0 : i32
    %0 = arith.cmpi eq, %arg1, %c0_i32 : i32
    %1 = arith.extui %0 : i1 to i32
    %c0_i32_0 = arith.constant 0 : i32
    %2 = arith.cmpi ne, %1, %c0_i32_0 : i32
    scf.if %2 {
      %cst_33 = arith.constant 0.000000e+00 : f32
      %75 = vector.broadcast %cst_33 : f32 to vector<16x128xf32>
      %c0_34 = arith.constant 0 : index
      %c0_35 = arith.constant 0 : index
      %c0_36 = arith.constant 0 : index
      %76 = vector.load %arg4[%c0_34, %c0_35, %c0_36] : memref<1x16x128xf32, #tpu.memory_space<vmem>>, vector<1x16x128xf32>
      %77 = vector.shape_cast %76 : vector<1x16x128xf32> to vector<16x128xf32>
      %78 = vector.shape_cast %75 : vector<16x128xf32> to vector<1x16x128xf32>
      tpu.vector_store %arg4[%c0_34, %c0_35, %c0_36], %78 {strides = array<i32>} : memref<1x16x128xf32, #tpu.memory_space<vmem>>, vector<1x16x128xf32>,
      %cst_37 = arith.constant 0.000000e+00 : f32
      %79 = vector.broadcast %cst_37 : f32 to vector<16x128xf32>
      %c0_38 = arith.constant 0 : index
      %c0_39 = arith.constant 0 : index
      %c0_40 = arith.constant 0 : index
      %80 = vector.load %arg5[%c0_38, %c0_39, %c0_40] : memref<1x16x128xf32, #tpu.memory_space<vmem>>, vector<1x16x128xf32>
      %81 = vector.shape_cast %80 : vector<1x16x128xf32> to vector<16x128xf32>
      %82 = vector.shape_cast %79 : vector<16x128xf32> to vector<1x16x128xf32>
      tpu.vector_store %arg5[%c0_38, %c0_39, %c0_40], %82 {strides = array<i32>} : memref<1x16x128xf32, #tpu.memory_space<vmem>>, vector<1x16x128xf32>,
      %cst_41 = arith.constant 0.000000e+00 : f32
      %83 = vector.broadcast %cst_41 : f32 to vector<16x128xf32>
      %c0_42 = arith.constant 0 : index
      %c0_43 = arith.constant 0 : index
      %c0_44 = arith.constant 0 : index
      %84 = vector.load %arg6[%c0_42, %c0_43, %c0_44] : memref<1x16x128xf32, #tpu.memory_space<vmem>>, vector<1x16x128xf32>
      %85 = vector.shape_cast %84 : vector<1x16x128xf32> to vector<16x128xf32>
      %86 = vector.shape_cast %83 : vector<16x128xf32> to vector<1x16x128xf32>
      tpu.vector_store %arg6[%c0_42, %c0_43, %c0_44], %86 {strides = array<i32>} : memref<1x16x128xf32, #tpu.memory_space<vmem>>, vector<1x16x128xf32>,
    } else {
    }
    %c0 = arith.constant 0 : index
    %c0_1 = arith.constant 0 : index
    %3 = vector.load %arg2[%c0, %c0_1] : memref<8x256xf32, #tpu.memory_space<vmem>>, vector<8x256xf32>
    %c0_2 = arith.constant 0 : index
    %c0_3 = arith.constant 0 : index
    %4 = vector.load %arg3[%c0_2, %c0_3] : memref<1x256xi32, #tpu.memory_space<vmem>>, vector<1x256xi32>
    %cst = arith.constant dense<0xFF800000> : vector<256xf32>
    %5 = vector.multi_reduction <maximumf>, %3, %cst [0] : vector<8x256xf32> to vector<256xf32>
    %6 = vector.shape_cast %5 : vector<256xf32> to vector<1x256xf32>
    %7 = vector.broadcast %6 : vector<1x256xf32> to vector<8x256xf32>
    %8 = arith.subf %3, %7 : vector<8x256xf32>
    %9 = math.exp %8 : vector<8x256xf32>
    %cst_4 = arith.constant dense<0.000000e+00> : vector<256xf32>
    %10 = vector.multi_reduction <add>, %9, %cst_4 [0] : vector<8x256xf32> to vector<256xf32>
    %11 = vector.shape_cast %10 : vector<256xf32> to vector<1x256xf32>
    %12 = tpu.reciprocal %11 : vector<1x256xf32> -> vector<1x256xf32>
    %13 = tpu.iota {dimensions = array<i32: 0>} : vector<8x256xi32>
    %14 = vector.broadcast %6 : vector<1x256xf32> to vector<8x256xf32>
    %15 = arith.cmpf oeq, %3, %14 : vector<8x256xf32>
    %c8_i32 = arith.constant 8 : i32
    %16 = vector.broadcast %c8_i32 : i32 to vector<8x256xi32>
    %17 = arith.select %15, %13, %16 : vector<8x256xi1>, vector<8x256xi32>
    %cst_5 = arith.constant dense<2147483647> : vector<256xi32>
    %18 = vector.multi_reduction <minsi>, %17, %cst_5 [0] : vector<8x256xi32> to vector<256xi32>
    %19 = vector.shape_cast %18 : vector<256xi32> to vector<1x256xi32>
    %20 = arith.cmpi eq, %19, %4 : vector<1x256xi32>
    %21 = arith.extui %20 : vector<1x256xi1> to vector<1x256xi32>
    %22 = arith.sitofp %21 : vector<1x256xi32> to vector<1x256xf32>
    %cst_6 = arith.constant 1.500000e+01 : f32
    %23 = vector.broadcast %cst_6 : f32 to vector<1x256xf32>
    %24 = arith.mulf %12, %23 : vector<1x256xf32>
    %25 = math.ceil %24 : vector<1x256xf32>
    %26 = arith.fptosi %25 : vector<1x256xf32> to vector<1x256xi32>
    %c1_i32 = arith.constant 1 : i32
    %27 = vector.broadcast %c1_i32 : i32 to vector<1x256xi32>
    %28 = arith.subi %26, %27 : vector<1x256xi32>
    %c0_i32_7 = arith.constant 0 : i32
    %c14_i32 = arith.constant 14 : i32
    %29 = vector.broadcast %c0_i32_7 : i32 to vector<1x256xi32>
    %30 = arith.maxsi %29, %28 : vector<1x256xi32>
    %31 = vector.broadcast %c14_i32 : i32 to vector<1x256xi32>
    %32 = arith.minsi %31, %30 : vector<1x256xi32>
    %33 = tpu.iota {dimensions = array<i32: 0>} : vector<16x1xi32>
    %34 = vector.broadcast %33 : vector<16x1xi32> to vector<16x256xi32>
    %35 = vector.broadcast %32 : vector<1x256xi32> to vector<16x256xi32>
    %36 = arith.cmpi eq, %34, %35 : vector<16x256xi32>
    %cst_8 = arith.constant 1.000000e+00 : f32
    %cst_9 = arith.constant 0.000000e+00 : f32
    %37 = vector.broadcast %cst_8 : f32 to vector<16x256xf32>
    %38 = vector.broadcast %cst_9 : f32 to vector<16x256xf32>
    %39 = arith.select %36, %37, %38 : vector<16x256xi1>, vector<16x256xf32>
    %cst_10 = arith.constant dense<0.000000e+00> : vector<16xf32>
    %40 = vector.multi_reduction <add>, %39, %cst_10 [1] : vector<16x256xf32> to vector<16xf32>
    %41 = vector.shape_cast %40 : vector<16xf32> to vector<16x1xf32>
    %cst_11 = arith.constant 0.000000e+00 : f32
    %42 = vector.shape_cast %12 : vector<1x256xf32> to vector<1x256xf32>
    %43 = vector.broadcast %42 : vector<1x256xf32> to vector<16x256xf32>
    %44 = vector.broadcast %cst_11 : f32 to vector<16x256xf32>
    %45 = arith.select %36, %43, %44 : vector<16x256xi1>, vector<16x256xf32>
    %cst_12 = arith.constant dense<0.000000e+00> : vector<16xf32>
    %46 = vector.multi_reduction <add>, %45, %cst_12 [1] : vector<16x256xf32> to vector<16xf32>
    %47 = vector.shape_cast %46 : vector<16xf32> to vector<16x1xf32>
    %cst_13 = arith.constant 0.000000e+00 : f32
    %48 = vector.shape_cast %22 : vector<1x256xf32> to vector<1x256xf32>
    %49 = vector.broadcast %48 : vector<1x256xf32> to vector<16x256xf32>
    %50 = vector.broadcast %cst_13 : f32 to vector<16x256xf32>
    %51 = arith.select %36, %49, %50 : vector<16x256xi1>, vector<16x256xf32>
    %cst_14 = arith.constant dense<0.000000e+00> : vector<16xf32>
    %52 = vector.multi_reduction <add>, %51, %cst_14 [1] : vector<16x256xf32> to vector<16xf32>
    %53 = vector.shape_cast %52 : vector<16xf32> to vector<16x1xf32>
    %c0_15 = arith.constant 0 : index
    %c0_16 = arith.constant 0 : index
    %c0_17 = arith.constant 0 : index
    %54 = vector.load %arg4[%c0_15, %c0_16, %c0_17] : memref<1x16x128xf32, #tpu.memory_space<vmem>>, vector<1x16x128xf32>
    %55 = vector.shape_cast %54 : vector<1x16x128xf32> to vector<16x128xf32>
    %56 = vector.broadcast %41 : vector<16x1xf32> to vector<16x128xf32>
    %57 = arith.addf %55, %56 : vector<16x128xf32>
    %c0_18 = arith.constant 0 : index
    %c0_19 = arith.constant 0 : index
    %c0_20 = arith.constant 0 : index
    %58 = vector.load %arg4[%c0_18, %c0_19, %c0_20] : memref<1x16x128xf32, #tpu.memory_space<vmem>>, vector<1x16x128xf32>
    %59 = vector.shape_cast %58 : vector<1x16x128xf32> to vector<16x128xf32>
    %60 = vector.shape_cast %57 : vector<16x128xf32> to vector<1x16x128xf32>
    tpu.vector_store %arg4[%c0_18, %c0_19, %c0_20], %60 {strides = array<i32>} : memref<1x16x128xf32, #tpu.memory_space<vmem>>, vector<1x16x128xf32>,
    %c0_21 = arith.constant 0 : index
    %c0_22 = arith.constant 0 : index
    %c0_23 = arith.constant 0 : index
    %61 = vector.load %arg5[%c0_21, %c0_22, %c0_23] : memref<1x16x128xf32, #tpu.memory_space<vmem>>, vector<1x16x128xf32>
    %62 = vector.shape_cast %61 : vector<1x16x128xf32> to vector<16x128xf32>
    %63 = vector.broadcast %47 : vector<16x1xf32> to vector<16x128xf32>
    %64 = arith.addf %62, %63 : vector<16x128xf32>
    %c0_24 = arith.constant 0 : index
    %c0_25 = arith.constant 0 : index
    %c0_26 = arith.constant 0 : index
    %65 = vector.load %arg5[%c0_24, %c0_25, %c0_26] : memref<1x16x128xf32, #tpu.memory_space<vmem>>, vector<1x16x128xf32>
    %66 = vector.shape_cast %65 : vector<1x16x128xf32> to vector<16x128xf32>
    %67 = vector.shape_cast %64 : vector<16x128xf32> to vector<1x16x128xf32>
    tpu.vector_store %arg5[%c0_24, %c0_25, %c0_26], %67 {strides = array<i32>} : memref<1x16x128xf32, #tpu.memory_space<vmem>>, vector<1x16x128xf32>,
    %c0_27 = arith.constant 0 : index
    %c0_28 = arith.constant 0 : index
    %c0_29 = arith.constant 0 : index
    %68 = vector.load %arg6[%c0_27, %c0_28, %c0_29] : memref<1x16x128xf32, #tpu.memory_space<vmem>>, vector<1x16x128xf32>
    %69 = vector.shape_cast %68 : vector<1x16x128xf32> to vector<16x128xf32>
    %70 = vector.broadcast %53 : vector<16x1xf32> to vector<16x128xf32>
    %71 = arith.addf %69, %70 : vector<16x128xf32>
    %c0_30 = arith.constant 0 : index
    %c0_31 = arith.constant 0 : index
    %c0_32 = arith.constant 0 : index
    %72 = vector.load %arg6[%c0_30, %c0_31, %c0_32] : memref<1x16x128xf32, #tpu.memory_space<vmem>>, vector<1x16x128xf32>
    %73 = vector.shape_cast %72 : vector<1x16x128xf32> to vector<16x128xf32>
    %74 = vector.shape_cast %71 : vector<16x128xf32> to vector<1x16x128xf32>
    tpu.vector_store %arg6[%c0_30, %c0_31, %c0_32], %74 {strides = array<i32>} : memref<1x16x128xf32, #tpu.memory_space<vmem>>, vector<1x16x128xf32>,
    return
  }
  func.func @transform_0(%arg0: i32, %arg1: i32) -> (i32, i32) {
    %c1_i32 = arith.constant 1 : i32
    %0 = arith.muli %arg0, %c1_i32 : i32
    %1 = arith.addi %0, %arg1 : i32
    %c0_i32 = arith.constant 0 : i32
    %c0_i32_0 = arith.constant 0 : i32
    return %c0_i32, %1 : i32, i32
  }
  func.func @transform_1(%arg0: i32, %arg1: i32) -> (i32, i32) {
    %c1_i32 = arith.constant 1 : i32
    %0 = arith.muli %arg0, %c1_i32 : i32
    %1 = arith.addi %0, %arg1 : i32
    %c0_i32 = arith.constant 0 : i32
    %c0_i32_0 = arith.constant 0 : i32
    return %c0_i32, %1 : i32, i32
  }
  func.func @transform_2(%arg0: i32, %arg1: i32) -> (i32, i32, i32) {
    %c0_i32 = arith.constant 0 : i32
    %c0_i32_0 = arith.constant 0 : i32
    %c0_i32_1 = arith.constant 0 : i32
    return %arg0, %c0_i32, %c0_i32_0 : i32, i32, i32
  }
  func.func @transform_3(%arg0: i32, %arg1: i32) -> (i32, i32, i32) {
    %c0_i32 = arith.constant 0 : i32
    %c0_i32_0 = arith.constant 0 : i32
    %c0_i32_1 = arith.constant 0 : i32
    return %arg0, %c0_i32, %c0_i32_0 : i32, i32, i32
  }
  func.func @transform_4(%arg0: i32, %arg1: i32) -> (i32, i32, i32) {
    %c0_i32 = arith.constant 0 : i32
    %c0_i32_0 = arith.constant 0 : i32
    %c0_i32_1 = arith.constant 0 : i32
    return %arg0, %c0_i32, %c0_i32_0 : i32, i32, i32
  }
}

</mosaic_0001>

<bundles_post_ra>
// kernel: tpu_custom_call.1
= control target key start
LH: loop header
LB: loop body
LE: loop exit
PB: predicated region body
PF: predicated region fallthrough
CT: control target
= control target key end

     0   :  { %10 = vsyncpa [#allocation3], 0  ;;  %s514_s0 = inlined_call_operand.hbm [shape: f32[8,256], index: 0, kind: input, shape index: {}]   ;;  %s515_s1 = inlined_call_operand.vmem [shape: s32[1,256], index: 1, kind: input, shape index: {}]   ;;  %s516_s2 = inlined_call_operand.hbm [shape: f32[1,16,128], index: 2, kind: output, shape index: {0}]   ;;  %s517_s3 = inlined_call_operand.hbm [shape: f32[1,16,128], index: 3, kind: output, shape index: {1}]   ;;  %s518_s4 = inlined_call_operand.hbm [shape: f32[1,16,128], index: 4, kind: output, shape index: {2}]  }
   0x1   :  { %11 = vsyncpa [#allocation4], 0 }
   0x2   :  { %12 = vsyncpa [#allocation7], 0  ;;  %s381_s15 = smov [#allocation2]   ;;  %s287_s19 = scalar_lea.hbm %s514_s0, 256 }
   0x3   :  { %s23_s16 = sshll.u32 %s381_s15, 4  ;;  %p288_p0 = scmp.ne.s32.totalorder %s514_s0, %s287_s19  ;;  %s24_s16 = int_to_ptr.vmem [resolvable:$true] %s23_s16 }
   0x4   :  { %p291_p1 = scmp.lt.u32.totalorder %s287_s19, %s514_s0 }
   0x6   :  { %p293_p2 = pnand %p291_p1, %p288_p0 }
   0x8   :  { %296 = shalt.err (!%p293_p2)
}
   0x9   :  { %s297_s24 = scalar_lea.vmem %s24_s16, 256  ;;  %p302_p4 = scmp.lt.s32.totalorder %s24_s16, %s24_s16 }
   0xa   :  { %p298_p3 = scmp.ne.s32.totalorder %s24_s16, %s297_s24  ;;  %p303_p5 = scmp.lt.s32.totalorder %s297_s24, %s297_s24 }
   0xc   :  { %p304_p6 = por %p303_p5, %p302_p4 }
   0xe   :  { %p305_p7 = pnand %p304_p6, %p298_p3 }
  0x10   :  { %308 = shalt.err (!%p305_p7)
}
  0x11   :  { %26 = dma.hbm_to_vmem [thread:$0]  %s514_s0, 256, %s24_s16, [#allocation3]  }
  0x12   :  { %375 = dma.done.wait [#allocation3], 256  }
  0x13   :  { %376 = vsyncadd [#allocation3], 4294967040  ;;  %v63_v0 = vld [vmem:[#allocation2] sm:$0xff]  ;;  %v64_v1 = vld [vmem:[#allocation2 + $0x8] sm:$0xff]  ;;  %v98_v18 = vlaneseq  ;;  %s384_s29 = smov [#allocation5]   ;;  %s385_s5 = smov [#allocation8]  }
  0x14   :  { %v66_v2 = vrot.slane %v63_v0, 4  ;;  %v72_v3 = vrot.slane %v64_v1, 4  ;;  %v65_v50 = vld [vmem:[%s515_s1] sm:$0x3]  ;;  %s383_s1 = smov [#allocation6]   ;;  %s218_s30 = sshll.u32 %s384_s29, 4  ;;  %s455_s30 = int_to_ptr.vmem [resolvable:$true] %s218_s30 }
  0x15   :  { %v425_v19 = vshrl.u32 %v98_v18, 7  ;;  %s230_s28 = sshll.u32 %s383_s1, 4  ;;  %s242_s6 = sshll.u32 %s385_s5, 4  ;;  %s231_s28 = int_to_ptr.vmem [resolvable:$true] %s230_s28  ;;  %s457_s6 = int_to_ptr.vmem [resolvable:$true] %s242_s6 }
  0x16   :  { %v67_v4 = vmax.f32 %v63_v0, %v66_v2  ;;  %v73_v5 = vmax.f32 %v64_v1, %v72_v3  ;;  %v382_v2 = vmov 0.0   ;;  %s309_s7 = scalar_lea.vmem %s231_s28, 256  ;;  %p314_p9 = scmp.lt.s32.totalorder %s231_s28, %s231_s28 }
  0x17   :  { %v124_v47 = vsub.s32 0, %v425_v19  ;;  %v128_v51 = vsub.s32 1, %v425_v19  ;;  %p310_p8 = scmp.ne.s32.totalorder %s231_s28, %s309_s7  ;;  %p315_p10 = scmp.lt.s32.totalorder %s309_s7, %s309_s7 }
  0x18   :  { %v68_v6 = vrot.slane %v67_v4, 2  ;;  %v74_v7 = vrot.slane %v73_v5, 2 }
  0x19   :  { %v125_v55 = vrot.slane %v65_v50, %v124_v47  ;;  %v129_v58 = vrot.slane %v65_v50, %v128_v51  ;;  %p316_p11 = por %p315_p10, %p314_p9 }
  0x1a   :  { %v69_v8 = vmax.f32 %v67_v4, %v68_v6  ;;  %v75_v9 = vmax.f32 %v73_v5, %v74_v7 }
  0x1b   :  { %p317_p12 = pnand %p316_p11, %p310_p8 }
  0x1c   :  { %v70_v10 = vrot.slane %v69_v8, 1  ;;  %v76_v11 = vrot.slane %v75_v9, 1 }
  0x1e   :  { %v71_v12 = vmax.f32 %v69_v8, %v70_v10  ;;  %v77_v13 = vmax.f32 %v75_v9, %v76_v11 }
  0x20   :  { %v78_v14 = vsub.f32 %v63_v0, %v71_v12  ;;  %v79_v15 = vsub.f32 %v64_v1, %v77_v13  ;;  %vm100_vm0 = vcmp.eq.f32.partialorder %v63_v0, %v71_v12  ;;  %vm101_vm1 = vcmp.eq.f32.partialorder %v64_v1, %v77_v13 }
  0x21   :  { %v102_v20 = vsel %vm100_vm0, %v425_v19, 8  ;;  %v103_v21 = vsel %vm101_vm1, %v425_v19, 8  ;;  %v152_v1 = vadd.s32 8, %v425_v19 }
  0x22   :  { %v80_v16 = vmul.f32 1.442695, %v78_v14  ;;  %v82_v17 = vmul.f32 1.442695, %v79_v15  ;;  %v104_v25 = vrot.slane %v102_v20, 4  ;;  %v113_v27 = vrot.slane %v103_v21, 4 }
  0x24   :  { %279 = vpow2.f32 %v80_v16  ;;  %vm105_vm2 = vcmp.lt.s32.totalorder %v102_v20, %v104_v25  ;;  %vm114_vm3 = vcmp.lt.s32.totalorder %v103_v21, %v113_v27 }
  0x25   :  { %281 = vpow2.f32 %v82_v17  ;;  %v106_v34 = vsel %vm105_vm2, %v102_v20, %v104_v25  ;;  %v115_v36 = vsel %vm114_vm3, %v103_v21, %v113_v27 }
  0x26   :  { %v107_v39 = vrot.slane %v106_v34, 2  ;;  %v116_v41 = vrot.slane %v115_v36, 2 }
  0x28   :  { %vm108_vm4 = vcmp.lt.s32.totalorder %v106_v34, %v107_v39  ;;  %vm117_vm5 = vcmp.lt.s32.totalorder %v115_v36, %v116_v41 }
  0x29   :  { %v109_v42 = vsel %vm108_vm4, %v106_v34, %v107_v39  ;;  %v118_v43 = vsel %vm117_vm5, %v115_v36, %v116_v41 }
  0x2a   :  { %v110_v44 = vrot.slane %v109_v42, 1  ;;  %v119_v45 = vrot.slane %v118_v43, 1 }
  0x2c   :  { %vm111_vm6 = vcmp.lt.s32.totalorder %v109_v42, %v110_v44  ;;  %vm120_vm7 = vcmp.lt.s32.totalorder %v118_v43, %v119_v45 }
  0x2d   :  { %v112_v57 = vsel %vm111_vm6, %v109_v42, %v110_v44  ;;  %v121_v60 = vsel %vm120_vm7, %v118_v43, %v119_v45 }
  0x2e   :  { %v280_v22 = vpop.eup %279  ;;  %vm130_vm8 = vcmp.eq.s32.totalorder %v112_v57, %v125_v55  ;;  %vm131_vm9 = vcmp.eq.s32.totalorder %v121_v60, %v129_v58 }
  0x2f   :  { %v282_v23 = vpop.eup %281  ;;  %v84_v24 = vrot.slane %v280_v22, 4  ;;  %v264_v3 = vsel %vm130_vm8, 1.0, %v382_v2  ;;  %v265_v5 = vsel %vm131_vm9, 1.0, %v382_v2 }
  0x30   :  { %v90_v26 = vrot.slane %v282_v23, 4  ;;  %v180_v8 = vrot.slane %v264_v3, %v124_v47  ;;  %v184_v10 = vrot.slane %v265_v5, %v124_v47 }
  0x31   :  { %v85_v28 = vadd.f32 %v280_v22, %v84_v24 }
  0x32   :  { %v91_v29 = vadd.f32 %v282_v23, %v90_v26 }
  0x33   :  { %v86_v30 = vrot.slane %v85_v28, 2 }
  0x34   :  { %v92_v31 = vrot.slane %v91_v29, 2 }
  0x35   :  { %v87_v32 = vadd.f32 %v86_v30, %v85_v28 }
  0x36   :  { %v93_v33 = vadd.f32 %v92_v31, %v91_v29 }
  0x37   :  { %v88_v35 = vrot.slane %v87_v32, 1 }
  0x38   :  { %v94_v37 = vrot.slane %v93_v33, 1 }
  0x39   :  { %v89_v38 = vadd.f32 %v88_v35, %v87_v32 }
  0x3a   :  { %v95_v40 = vadd.f32 %v94_v37, %v93_v33 }
  0x3b   :  { %283 = vrcp.f32 %v89_v38 }
  0x3c   :  { %285 = vrcp.f32 %v95_v40 }
  0x45   :  { %v284_v46 = vpop.eup %283 }
  0x46   :  { %v286_v48 = vpop.eup %285  ;;  %v136_v49 = vmul.f32 15.0, %v284_v46 }
  0x47   :  { %v137_v52 = vmul.f32 15.0, %v286_v48 }
  0x48   :  { %v138_v53 = vceil.f32 %v136_v49 }
  0x49   :  { %v139_v54 = vceil.f32 %v137_v52 }
  0x4a   :  { %v268_v56 = vtrunc.f32 %v138_v53 }
  0x4b   :  { %v270_v59 = vtrunc.f32 %v139_v54 }
  0x4c   :  { %v269_v61 = vcvt.f32.s32 %v268_v56 }
  0x4d   :  { %v271_v62 = vcvt.f32.s32 %v270_v59 }
  0x4e   :  { %v266_v63 = vadd.s32 4294967295, %v269_v61 }
  0x4f   :  { %v267_v0 = vadd.s32 4294967295, %v271_v62 }
  0x50   :  { %vm144_vm10 = vcmp.gt.s32.totalorder %v266_v63, 0 }
  0x51   :  { %v145_v4 = vsel %vm144_vm10, %v266_v63, 0  ;;  %vm146_vm11 = vcmp.gt.s32.totalorder %v267_v0, 0 }
  0x52   :  { %v147_v6 = vsel %vm146_vm11, %v267_v0, 0  ;;  %vm148_vm12 = vcmp.lt.s32.totalorder %v145_v4, 14 }
  0x53   :  { %v149_v7 = vsel %vm148_vm12, %v145_v4, 14  ;;  %vm150_vm13 = vcmp.lt.s32.totalorder %v147_v6, 14 }
  0x54   :  { %v151_v9 = vsel %vm150_vm13, %v147_v6, 14  ;;  %vm153_vm14 = vcmp.eq.s32.totalorder %v425_v19, %v149_v7  ;;  %vm155_vm15 = vcmp.eq.s32.totalorder %v152_v1, %v149_v7 }
  0x55   :  { %vm154_vm0 = vcmp.eq.s32.totalorder %v425_v19, %v151_v9  ;;  %v167_v11 = vsel %vm153_vm14, %v284_v46, 0.0  ;;  %v157_v12 = vsel %vm153_vm14, 1.0, %v382_v2  ;;  %vm156_vm1 = vcmp.eq.s32.totalorder %v152_v1, %v151_v9 }
  0x56   :  { %v168_v13 = vsel %vm154_vm0, %v286_v48, 0.0  ;;  %v158_v14 = vsel %vm154_vm0, 1.0, %v382_v2  ;;  %v169_v15 = vsel %vm155_vm15, %v284_v46, 0.0  ;;  %v170_v16 = vsel %vm156_vm1, %v286_v48, 0.0 }
  0x57   :  { %v171_v17 = vadd.f32 %v168_v13, %v167_v11  ;;  %v161_v18 = vadd.f32 %v158_v14, %v157_v12  ;;  %v159_v20 = vsel %vm155_vm15, 1.0, %v382_v2  ;;  %v160_v21 = vsel %vm156_vm1, 1.0, %v382_v2 }
  0x58   :  { %v174_v22 = vadd.f32 %v170_v16, %v169_v15  ;;  %v164_v23 = vadd.f32 %v160_v21, %v159_v20  ;;  %v185_v24 = vsel %vm153_vm14, %v180_v8, 0.0  ;;  %v186_v25 = vsel %vm154_vm0, %v184_v10, 0.0 }
  0x59   :  { %172 = vadd.xlane.f32.xlu0 %v171_v17  ;;  %162 = vadd.xlane.f32.xlu1 %v161_v18  ;;  %v187_v26 = vsel %vm155_vm15, %v180_v8, 0.0  ;;  %v188_v27 = vsel %vm156_vm1, %v184_v10, 0.0  ;;  %v189_v28 = vadd.f32 %v186_v25, %v185_v24 }
  0x5a   :  { %v192_v29 = vadd.f32 %v188_v27, %v187_v26 }
  0x5d   :  { %175 = vadd.xlane.f32.xlu0 %v174_v22  ;;  %165 = vadd.xlane.f32.xlu1 %v164_v23 }
  0x61   :  { %190 = vadd.xlane.f32.xlu0 %v189_v28  ;;  %193 = vadd.xlane.f32.xlu1 %v192_v29 }
  0xe6   :  { %v173_v30 = vpop.xlane.xlu0 %172  ;;  %v163_v31 = vpop.xlane.xlu1 %162 }
  0xe7   :  { %205 = vst [vmem:[#allocation6] sm:$0xff] %v173_v30  ;;  %199 = vst [vmem:[#allocation5] sm:$0xff] %v163_v31 }
  0xea   :  { %v176_v19 = vpop.xlane.xlu0 %175  ;;  %v166_v32 = vpop.xlane.xlu1 %165 }
  0xeb   :  { %206 = vst [vmem:[#allocation6 + $0x8] sm:$0xff] %v176_v19  ;;  %200 = vst [vmem:[#allocation5 + $0x8] sm:$0xff] %v166_v32 }
  0xee   :  { %v191_v33 = vpop.xlane.xlu0 %190  ;;  %v194_v34 = vpop.xlane.xlu1 %193 }
  0xef   :  { %320 = shalt.err (!%p317_p12)
}
  0xf0   :  { %s321_s10 = scalar_lea.hbm %s517_s3, 256 }
  0xf1   :  { %p322_p13 = scmp.ne.s32.totalorder %s517_s3, %s321_s10  ;;  %p325_p0 = scmp.lt.u32.totalorder %s321_s10, %s517_s3 }
  0xf3   :  { %p327_p1 = pnand %p325_p0, %p322_p13 }
  0xf5   :  { %330 = shalt.err (!%p327_p1)
}
  0xf6   :  { %s386_s15 = smov 128   ;;  %s387_s16 = smov 8  }
  0xf7   :  { %236 = dma.vmem_to_hbm [thread:$0]  %s231_s28, 256, %s517_s3, [#allocation7], %s386_s15, %s386_s15, %s387_s16  }
  0xf8   :  { %s331_s19 = scalar_lea.vmem %s455_s30, 256  ;;  %p336_p3 = scmp.lt.s32.totalorder %s455_s30, %s455_s30 }
  0xf9   :  { %p332_p2 = scmp.ne.s32.totalorder %s455_s30, %s331_s19  ;;  %p337_p4 = scmp.lt.s32.totalorder %s331_s19, %s331_s19 }
  0xfb   :  { %p338_p5 = por %p337_p4, %p336_p3 }
  0xfd   :  { %p339_p6 = pnand %p338_p5, %p332_p2 }
  0xff   :  { %342 = shalt.err (!%p339_p6)
}
 0x100   :  { %s343_s22 = scalar_lea.hbm %s516_s2, 256 }
 0x101   :  { %p344_p7 = scmp.ne.s32.totalorder %s516_s2, %s343_s22  ;;  %p347_p8 = scmp.lt.u32.totalorder %s343_s22, %s516_s2 }
 0x103   :  { %p349_p9 = pnand %p347_p8, %p344_p7 }
 0x105   :  { %352 = shalt.err (!%p349_p9)
}
 0x106   :  { %224 = dma.vmem_to_hbm [thread:$0]  %s455_s30, 256, %s516_s2, [#allocation4], %s386_s15, %s386_s15, %s387_s16   ;;  %211 = vst [vmem:[#allocation8] sm:$0xff] %v191_v33  ;;  %212 = vst [vmem:[#allocation8 + $0x8] sm:$0xff] %v194_v34 }
 0x107   :  { %s353_s27 = scalar_lea.vmem %s457_s6, 256  ;;  %p358_p11 = scmp.lt.s32.totalorder %s457_s6, %s457_s6 }
 0x108   :  { %p354_p10 = scmp.ne.s32.totalorder %s457_s6, %s353_s27  ;;  %p359_p12 = scmp.lt.s32.totalorder %s353_s27, %s353_s27 }
 0x10a   :  { %p360_p13 = por %p359_p12, %p358_p11 }
 0x10c   :  { %p361_p0 = pnand %p360_p13, %p354_p10 }
 0x10e   :  { %364 = shalt.err (!%p361_p0)
}
 0x10f   :  { %s365_s29 = scalar_lea.hbm %s518_s4, 256 }
 0x110   :  { %p366_p1 = scmp.ne.s32.totalorder %s518_s4, %s365_s29  ;;  %p369_p2 = scmp.lt.u32.totalorder %s365_s29, %s518_s4 }
 0x112   :  { %p371_p3 = pnand %p369_p2, %p366_p1 }
 0x114   :  { %374 = shalt.err (!%p371_p3)
}
 0x115   :  { %248 = dma.vmem_to_hbm [thread:$0]  %s457_s6, 256, %s518_s4, [#allocation7], %s386_s15, %s386_s15, %s387_s16  }
 0x116   :  { %377 = dma.done.wait [#allocation4], 256  }
 0x117   :  { %378 = vsyncadd [#allocation4], 4294967040 }
 0x118   :  { %379 = dma.done.wait [#allocation7], 512  }
 0x119   :  { %380 = vsyncadd [#allocation7], 4294966784 }
 0x11a   :  { %258 = vsyncpa [#allocation3], 1 }
 0x11b   :  { %259 = vsyncpa [#allocation4], 1 }
 0x11c   :  { %260 = vsyncpa [#allocation7], 1 }

</bundles_post_ra>
